<compile_context>
chip_gen: v7x
topology: tpu7x:2x2x1
jax: 0.10.0
libtpu: 0.0.40
codegen_flags: <defaults>
</compile_context>

<pallas_src>
import functools

import jax
import jax.numpy as jnp
from jax.experimental import pallas as pl
from jax.experimental.pallas import tpu as pltpu


def _attention2_kernel(
    x_ref, w1_ref, b1_ref, w2_ref, b2_ref, out_ref, *, n_valid, tile_n, n_tiles
):
    # x_ref: (tile_n, L)  w1: (L, D)  b1: (1, D)  w2: (D, K)  b2: (K, 1)
    # out_ref: (K, N_pad) resident block (same block index across the n axis).
    n = pl.program_id(1)

    # First linear (bf16 MXU operands, f32 accumulate) + bias + tanh in f32.
    h = jnp.dot(
        x_ref[...].astype(jnp.bfloat16),
        w1_ref[...].astype(jnp.bfloat16),
        preferred_element_type=jnp.float32,
    )
    h = jnp.tanh(h + b1_ref[...])  # (tile_n, D), f32

    # Second linear emitted directly in (K, tile_n) layout on the MXU
    # (contract D between w2 (D, K) and h (tile_n, D)) -> no XLU transpose.
    logits = jax.lax.dot_general(
        w2_ref[...].astype(jnp.bfloat16),
        h.astype(jnp.bfloat16),
        dimension_numbers=(((0,), (1,)), ((), ())),
        preferred_element_type=jnp.float32,
    )
    logits = logits + b2_ref[...]  # (K, tile_n) + (K, 1)

    # Mask padded instance columns so they get exactly zero attention weight.
    col = jax.lax.broadcasted_iota(jnp.int32, logits.shape, 1) + n * tile_n
    logits = jnp.where(col < n_valid, logits, -1e30)

    def _softmax(z):
        m = jnp.max(z, axis=-1, keepdims=True)
        e = jnp.exp(z - m)
        denom = jnp.sum(e, axis=-1, keepdims=True)
        return e * pl.reciprocal(denom, approx=True)

    if n_tiles == 1:
        # Single-tile fast path: softmax fused, one lane-dense store.
        out_ref[...] = _softmax(logits).astype(out_ref.dtype)
    else:
        # Stage this tile's logits into the resident output block.
        start = pl.multiple_of(n * tile_n, 128)
        out_ref[:, pl.ds(start, tile_n)] = logits

        # On the last N tile, run the softmax over the full (K, N_pad) row block.
        @pl.when(n == n_tiles - 1)
        def _finalize():
            out_ref[...] = _softmax(out_ref[...]).astype(out_ref.dtype)


def attention2_batched(x, w1, b1, w2, b2, *, max_tile_n=512):
    """Batched Attention2: x (B, N, L) -> attention weights (B, K, N)."""
    B, N, L = x.shape
    D = w1.shape[1]
    K = w2.shape[1]
    assert w1.shape == (L, D) and w2.shape == (D, K)
    assert max_tile_n % 128 == 0
    b1 = b1.reshape(1, D)
    b2 = b2.reshape(K, 1)  # broadcasts straight onto the (K, tile_n) logits

    # Pad N so the (K, N_pad) output is lane-dense and evenly tiled along N.
    n_pad128 = int(pl.cdiv(max(N, 1), 128)) * 128
    tile_n = n_pad128 if n_pad128 <= max_tile_n else max_tile_n
    n_pad = int(pl.cdiv(max(N, 1), tile_n)) * tile_n
    n_tiles = n_pad // tile_n
    if n_pad != N:
        x = jnp.pad(x, ((0, 0), (0, n_pad - N), (0, 0)))

    kernel = functools.partial(
        _attention2_kernel, n_valid=N, tile_n=tile_n, n_tiles=n_tiles
    )

    out = pl.pallas_call(
        kernel,
        out_shape=jax.ShapeDtypeStruct((B, K, n_pad), jnp.float32),
        grid=(B, n_tiles),
        in_specs=[
            pl.BlockSpec((None, tile_n, L), lambda b, n: (b, n, 0)),  # x tile
            pl.BlockSpec((L, D), lambda b, n: (0, 0)),                # W1 resident
            pl.BlockSpec((1, D), lambda b, n: (0, 0)),                # b1 resident
            pl.BlockSpec((D, K), lambda b, n: (0, 0)),                # W2 resident
            pl.BlockSpec((K, 1), lambda b, n: (0, 0)),                # b2 resident
        ],
        # Output block index ignores n -> stays resident in VMEM across the N tiles.
        out_specs=pl.BlockSpec((None, K, n_pad), lambda b, n: (b, 0, 0)),
        compiler_params=pltpu.CompilerParams(
            dimension_semantics=("parallel", "arbitrary"),  # bags parallel, N reduction
        ),
    )(x, w1, b1, w2, b2)

    return out[:, :, :N]


def attention2(x, w1, b1, w2, b2):
    """Single-bag path matching Attention2.forward: x (N, L) -> (K, N)."""
    # TODO(synk): the isNorm=False branch (return raw logits) is not implemented;
    # this kernel always applies the softmax (the module default).
    return attention2_batched(x[None], w1, b1, w2, b2)[0]


def attention2_ref(x, w1, b1, w2, b2):
    h = jnp.tanh(x @ w1 + b1.reshape(1, -1))
    logits = h @ w2 + b2.reshape(1, -1)
    a = jnp.swapaxes(logits, -1, -2)
    return jax.nn.softmax(a, axis=-1)


if __name__ == "__main__":
    # Small shapes consistent with the module: B bags of N instances with L features.
    B, N, L, D, K = 2, 16, 32, 16, 1

    key = jax.random.PRNGKey(0)
    kx, kw1, kb1, kw2, kb2, kx2 = jax.random.split(key, 6)

    x = jax.random.normal(kx, (B, N, L), dtype=jnp.float32)
    w1 = jax.random.normal(kw1, (L, D), dtype=jnp.float32) * 0.1
    b1 = jax.random.normal(kb1, (1, D), dtype=jnp.float32) * 0.1
    w2 = jax.random.normal(kw2, (D, K), dtype=jnp.float32) * 0.1
    b2 = jax.random.normal(kb2, (1, K), dtype=jnp.float32) * 0.1

    # Single-tile path.
    out = jax.block_until_ready(attention2_batched(x, w1, b1, w2, b2))
    ref = attention2_ref(x, w1, b1, w2, b2)
    assert out.shape == (B, K, N)
    # bf16 MXU operands + approx reciprocal -> relaxed tolerance vs f32 reference.
    assert jnp.allclose(out, ref, atol=2e-2, rtol=2e-2), (
        f"mismatch vs reference, max abs err = {float(jnp.max(jnp.abs(out - ref)))}"
    )
    # Attention weights must sum to 1 over the N instances.
    assert jnp.allclose(out.sum(axis=-1), 1.0, atol=1e-2)

    # Single-bag path matching the PyTorch forward signature: (N, L) -> (K, N).
    out1 = jax.block_until_ready(attention2(x[0], w1, b1, w2, b2))
    assert out1.shape == (K, N)
    assert jnp.allclose(out1, ref[0], atol=2e-2, rtol=2e-2)

    # Multi-tile path (N spans several tiles; exercises the staged softmax finalize).
    N2 = 200
    x2 = jax.random.normal(kx2, (B, N2, L), dtype=jnp.float32)
    out2 = jax.block_until_ready(
        attention2_batched(x2, w1, b1, w2, b2, max_tile_n=128)
    )
    ref2 = attention2_ref(x2, w1, b1, w2, b2)
    assert out2.shape == (B, K, N2)
    assert jnp.allclose(out2, ref2, atol=2e-2, rtol=2e-2), (
        f"tiled mismatch, max abs err = {float(jnp.max(jnp.abs(out2 - ref2)))}"
    )
    assert jnp.allclose(out2.sum(axis=-1), 1.0, atol=1e-2)

    print("KERNEL_OK")
</pallas_src>

<mosaic_0001>
module attributes {stable_mosaic.version = 11 : i64} {
  func.func @_attention2_kernel(%arg0: i32, %arg1: i32, %arg2: memref<1x128x32xf32, #tpu.memory_space<vmem>>, %arg3: memref<32x16xf32, #tpu.memory_space<vmem>>, %arg4: memref<1x16xf32, #tpu.memory_space<vmem>>, %arg5: memref<16x1xf32, #tpu.memory_space<vmem>>, %arg6: memref<1x1xf32, #tpu.memory_space<vmem>>, %arg7: memref<1x1x128xf32, #tpu.memory_space<vmem>>) attributes {dimension_semantics = [#tpu.dimension_semantics<parallel>, #tpu.dimension_semantics<arbitrary>], iteration_bounds = array<i64: 2, 1>, scalar_prefetch = 0 : i64, scratch_operands = 0 : i64, tpu.core_type = #tpu.core_type<tc>, window_params = [{transform_indices = @transform_0, window_bounds = array<i64: 1, 128, 32>}, {pipeline_mode = #tpu.pipeline_mode<synchronous>, transform_indices = @transform_1, window_bounds = array<i64: 32, 16>}, {pipeline_mode = #tpu.pipeline_mode<synchronous>, transform_indices = @transform_2, window_bounds = array<i64: 1, 16>}, {pipeline_mode = #tpu.pipeline_mode<synchronous>, transform_indices = @transform_3, window_bounds = array<i64: 16, 1>}, {pipeline_mode = #tpu.pipeline_mode<synchronous>, transform_indices = @transform_4, window_bounds = array<i64: 1, 1>}, {transform_indices = @transform_5, window_bounds = array<i64: 1, 1, 128>}]} {
    %c0 = arith.constant 0 : index
    %c0_0 = arith.constant 0 : index
    %c0_1 = arith.constant 0 : index
    %0 = vector.load %arg2[%c0, %c0_0, %c0_1] : memref<1x128x32xf32, #tpu.memory_space<vmem>>, vector<1x128x32xf32>
    %1 = vector.shape_cast %0 : vector<1x128x32xf32> to vector<128x32xf32>
    %2 = arith.truncf %1 : vector<128x32xf32> to vector<128x32xbf16>
    %c0_2 = arith.constant 0 : index
    %c0_3 = arith.constant 0 : index
    %3 = vector.load %arg3[%c0_2, %c0_3] : memref<32x16xf32, #tpu.memory_space<vmem>>, vector<32x16xf32>
    %4 = arith.truncf %3 : vector<32x16xf32> to vector<32x16xbf16>
    %cst = arith.constant dense<0.000000e+00> : vector<128x16xf32>
    %5 = tpu.matmul %2, %4, %cst {dimension_numbers = #tpu.dot_dimension_numbers<[1], [0], [0], [1], [0, 0, 1, 1], [], []>} : vector<128x32xbf16>, vector<32x16xbf16>, vector<128x16xf32> -> vector<128x16xf32>
    %c0_4 = arith.constant 0 : index
    %c0_5 = arith.constant 0 : index
    %6 = vector.load %arg4[%c0_4, %c0_5] : memref<1x16xf32, #tpu.memory_space<vmem>>, vector<1x16xf32>
    %7 = vector.broadcast %6 : vector<1x16xf32> to vector<128x16xf32>
    %8 = arith.addf %5, %7 : vector<128x16xf32>
    %9 = math.tanh %8 : vector<128x16xf32>
    %c0_6 = arith.constant 0 : index
    %c0_7 = arith.constant 0 : index
    %10 = vector.load %arg5[%c0_6, %c0_7] : memref<16x1xf32, #tpu.memory_space<vmem>>, vector<16x1xf32>
    %11 = arith.truncf %10 : vector<16x1xf32> to vector<16x1xbf16>
    %12 = arith.truncf %9 : vector<128x16xf32> to vector<128x16xbf16>
    %cst_8 = arith.constant dense<0.000000e+00> : vector<1x128xf32>
    %13 = tpu.matmul %11, %12, %cst_8 {dimension_numbers = #tpu.dot_dimension_numbers<[0], [1], [1], [0], [0, 1, 1, 0], [], []>} : vector<16x1xbf16>, vector<128x16xbf16>, vector<1x128xf32> -> vector<1x128xf32>
    %c0_9 = arith.constant 0 : index
    %c0_10 = arith.constant 0 : index
    %14 = vector.load %arg6[%c0_9, %c0_10] : memref<1x1xf32, #tpu.memory_space<vmem>>, vector<1x1xf32>
    %15 = vector.broadcast %14 : vector<1x1xf32> to vector<1x128xf32>
    %16 = arith.addf %13, %15 : vector<1x128xf32>
    %17 = tpu.iota {dimensions = array<i32: 1>} : vector<1x128xi32>
    %c128_i32 = arith.constant 128 : i32
    %18 = arith.muli %arg1, %c128_i32 : i32
    %19 = vector.broadcast %18 : i32 to vector<1x128xi32>
    %20 = arith.addi %17, %19 : vector<1x128xi32>
    %c16_i32 = arith.constant 16 : i32
    %21 = vector.broadcast %c16_i32 : i32 to vector<1x128xi32>
    %22 = arith.cmpi slt, %20, %21 : vector<1x128xi32>
    %cst_11 = arith.constant -1.000000e+30 : f32
    %23 = vector.broadcast %cst_11 : f32 to vector<1x128xf32>
    %24 = arith.select %22, %16, %23 : vector<1x128xi1>, vector<1x128xf32>
    %cst_12 = arith.constant dense<0xFF800000> : vector<1xf32>
    %25 = vector.multi_reduction <maximumf>, %24, %cst_12 [1] : vector<1x128xf32> to vector<1xf32>
    %26 = vector.shape_cast %25 : vector<1xf32> to vector<1x1xf32>
    %27 = vector.broadcast %26 : vector<1x1xf32> to vector<1x128xf32>
    %28 = arith.subf %24, %27 : vector<1x128xf32>
    %29 = math.exp %28 : vector<1x128xf32>
    %cst_13 = arith.constant dense<0.000000e+00> : vector<1xf32>
    %30 = vector.multi_reduction <add>, %29, %cst_13 [1] : vector<1x128xf32> to vector<1xf32>
    %31 = vector.shape_cast %30 : vector<1xf32> to vector<1x1xf32>
    %32 = tpu.reciprocal %31 {approx = true} : vector<1x1xf32> -> vector<1x1xf32>
    %33 = vector.broadcast %32 : vector<1x1xf32> to vector<1x128xf32>
    %34 = arith.mulf %29, %33 : vector<1x128xf32>
    %c0_14 = arith.constant 0 : index
    %c0_15 = arith.constant 0 : index
    %c0_16 = arith.constant 0 : index
    %35 = vector.load %arg7[%c0_14, %c0_15, %c0_16] : memref<1x1x128xf32, #tpu.memory_space<vmem>>, vector<1x1x128xf32>
    %36 = vector.shape_cast %35 : vector<1x1x128xf32> to vector<1x128xf32>
    %37 = vector.shape_cast %34 : vector<1x128xf32> to vector<1x1x128xf32>
    tpu.vector_store %arg7[%c0_14, %c0_15, %c0_16], %37 {strides = array<i32>} : memref<1x1x128xf32, #tpu.memory_space<vmem>>, vector<1x1x128xf32>,
    return
  }
  func.func @transform_0(%arg0: i32, %arg1: i32) -> (i32, i32, i32) {
    %c0_i32 = arith.constant 0 : i32
    %c0_i32_0 = arith.constant 0 : i32
    return %arg0, %arg1, %c0_i32 : i32, i32, i32
  }
  func.func @transform_1(%arg0: i32, %arg1: i32) -> (i32, i32) {
    %c0_i32 = arith.constant 0 : i32
    %c0_i32_0 = arith.constant 0 : i32
    %c0_i32_1 = arith.constant 0 : i32
    return %c0_i32, %c0_i32_0 : i32, i32
  }
  func.func @transform_2(%arg0: i32, %arg1: i32) -> (i32, i32) {
    %c0_i32 = arith.constant 0 : i32
    %c0_i32_0 = arith.constant 0 : i32
    %c0_i32_1 = arith.constant 0 : i32
    return %c0_i32, %c0_i32_0 : i32, i32
  }
  func.func @transform_3(%arg0: i32, %arg1: i32) -> (i32, i32) {
    %c0_i32 = arith.constant 0 : i32
    %c0_i32_0 = arith.constant 0 : i32
    %c0_i32_1 = arith.constant 0 : i32
    return %c0_i32, %c0_i32_0 : i32, i32
  }
  func.func @transform_4(%arg0: i32, %arg1: i32) -> (i32, i32) {
    %c0_i32 = arith.constant 0 : i32
    %c0_i32_0 = arith.constant 0 : i32
    %c0_i32_1 = arith.constant 0 : i32
    return %c0_i32, %c0_i32_0 : i32, i32
  }
  func.func @transform_5(%arg0: i32, %arg1: i32) -> (i32, i32, i32) {
    %c0_i32 = arith.constant 0 : i32
    %c0_i32_0 = arith.constant 0 : i32
    %c0_i32_1 = arith.constant 0 : i32
    return %arg0, %c0_i32, %c0_i32_0 : i32, i32, i32
  }
}

</mosaic_0001>

<bundles_post_ra>
// kernel: tpu_custom_call.1
= control target key start
LH: loop header
LB: loop body
LE: loop exit
PB: predicated region body
PF: predicated region fallthrough
CT: control target
= control target key end

     0   :  { %s1122_s0 = inlined_call_operand.vmem [shape: f32[2,128,32], index: 0, kind: input, shape index: {}]   ;;  %s1123_s1 = inlined_call_operand.vmem [shape: f32[32,16], index: 1, kind: input, shape index: {}]   ;;  %s1124_s2 = inlined_call_operand.vmem [shape: f32[1,16], index: 2, kind: input, shape index: {}]   ;;  %s1125_s3 = inlined_call_operand.vmem [shape: f32[16,1], index: 3, kind: input, shape index: {}]   ;;  %s1126_s4 = inlined_call_operand.<no memory space> [shape: f32[1,1], index: 4, kind: input, shape index: {}]   ;;  %s1127_s5 = inlined_call_operand.hbm [shape: f32[2,1,128], index: 5, kind: output, shape index: {}]  }
   0x1   :  { %v10_v0 = vstv %s1126_s4 }
   0x2   :  { %11 = vst [vmem:[#allocation2] sm:$0x1] %v10_v0 }
   0x3   :  { %12 = vsyncpa [#allocation4], 0 }
   0x4   :  { %14 = vsyncpa [#allocation4 + $0x1], 0  ;;  %s927_s20 = smov 0   ;;  %s929_s21 = smov 0  }
   0x5   :  { %s931_s22 = smov 0   ;;  %s933_s23 = smov 0  }
   0x6   :  { %s935_s24 = smov 0   ;;  %s937_s25 = smov 0  }
   0x7 LB: > { %s635_s4 = sadd.s32 4294967295, %s888_s25   ;;  %s636_s26 = sadd.s32 4294967294, %s888_s25   ;;  %s888_s25 = sphi %s937_s25, %s20_s25   ;;  %s884_s24 = sphi %s935_s24, %s1134_s24   ;;  %s880_s23 = sphi %s933_s23, %s1133_s23   ;;  %s876_s22 = sphi %s931_s22, %s1132_s22   ;;  %s872_s21 = sphi %s929_s21, %s1131_s21   ;;  %s868_s20 = sphi %s927_s20, %s1130_s20  }
   0x8   : > { %s32_s27 = sadd.s32 1, %s884_s24  ;;  %s151_s28 = sadd.s32 1, %s876_s22 }
   0x9   : > { %p34_p0 = scmp.ge.s32.totalorder %s32_s27, 2  ;;  %p161_p1 = scmp.ne.s32.totalorder %s876_s22, %s872_s21 }
   0xa   : > { %p162_p2 = scmp.eq.s32.totalorder %s635_s4, 1  ;;  %p167_p3 = scmp.ne.s32.totalorder %s872_s21, %s868_s20 }
   0xb   : > { %s1136_s27 = smov (%p34_p0, %s32_s27), 0  ;;  %p168_p5 = scmp.eq.s32.totalorder %s636_s26, 1 }
   0xc   : > { %p967_p4 = por %p162_p2, %p161_p1  ;;  %s148_s30 = ssub.s32 %s884_s24, %s1136_s27 }
   0xd   : > { %p639_p6 = scmp.ge.s32.totalorder %s888_s25, 1  ;;  %p149_p7 = scmp.eq.s32.totalorder %s148_s30, 0 }
   0xe   : > { %p974_p8 = por %p168_p5, %p167_p3  ;;  %p211_p9 = scmp.lt.s32.totalorder %s888_s25, 3 }
   0xf   : > { %s980_s7 = scalar_select %p149_p7, %s876_s22, %s151_s28  }
  0x10   : > { %p212_p10 = pnand %p639_p6, %p211_p9 }
  0x11   : > { %v277_v1 = vld [vmem:[%s1123_s1] sm:$0xff] (!%p212_p10)  ;;  %v278_v2 = vld [vmem:[%s1123_s1 + $0x8] sm:$0xff] (!%p212_p10)  ;;  %v279_v3 = vld [vmem:[%s1123_s1 + $0x10] sm:$0xff] (!%p212_p10)  ;;  %p243_p11 = scmp.lt.s32.totalorder (!%p212_p10), %s880_s23, 1  ;;  %vm290_vm0 = vcmask (!%p212_p10), 261120   ;;  %v890_v34 = vmov (!%p212_p10), 0.0  }
  0x12   : > { %215 = sbr.rel (%p212_p10) target bundleno = 870 (0x366), region = 40  ;;  %v281_v4 = vpack.c.bf16 (!%p212_p10), %v278_v2, %v277_v1  ;;  %v280_v5 = vld [vmem:[%s1123_s1 + $0x18] sm:$0xff] (!%p212_p10)  ;;  %v428_v6 = vld [vmem:[%s1125_s3] sm:$0xff] (!%p212_p10)  ;;  %v429_v7 = vld [vmem:[%s1125_s3 + $0x8] sm:$0xff] (!%p212_p10)  ;;  %695 = vmatprep.subr.bf16.mxu1 (!%p212_p10), %v890_v34  ;;  %vm891_vm1 = vmmov (!%p212_p10), 0   ;;  %v892_v36 = vmov (!%p212_p10), 0  }
  0x13   : > { %v282_v8 = vpack.c.bf16 (!%p212_p10), %v280_v5, %v279_v3  ;;  %v430_v9 = vpack.c.bf16 (!%p212_p10), %v429_v7, %v428_v6  ;;  %711 = vmatprep.mubr.msk.bf16.mxu1 (!%p212_p10), %vm891_vm1, %v890_v34  ;;  %v439_v35 = vld [vmem:[#allocation2] sm:$0x1] (!%p212_p10)  ;;  %vm465_vm2 = vcmask (!%p212_p10), 130048   ;;  %vm540_vm4 = vcmask (!%p212_p10), 1040384   ;;  %s240_s11 = sand.u32 (!%p212_p10), 1, %s872_s21   ;;  %s652_s12 = sshll.u32 (!%p212_p10), %s880_s23, 4 }
  0x14   : > { %675 = vmatprep.subr.bf16.mxu0 (!%p212_p10), %v281_v4  ;;  %v1036_v37 = vld [vmem:[%s1124_s2] ss:$0 sm:$0xff] (!%p212_p10)  ;;  %s241_s13 = scalar_lea.vmem (!%p212_p10), [#allocation3], %s240_s11  ;;  %s1075_s17 = scalar_lea.hbm (!%p212_p10), %s1127_s5, %s652_s12 }
  0x15   : > { %676 = vmatpush3.bf16.msra.mxu0 (!%p212_p10), %v281_v4  ;;  %449 = vxpose.xlu0.c.b16.start.end [1/1] (short) (narrow) (!%p212_p10), %v430_v9, 16  ;;  %s566_s14 = sshll.u32 (!%p212_p10), %s241_s13, 4  ;;  %s554_s18 = scalar_lea.sflag (!%p212_p10), [#allocation4], %s240_s11  ;;  %s1077_s14 = int_to_ptr.vmem [resolvable:$true] %s566_s14 }
  0x16   : > { %677 = vmatprep.subr.bf16.mxu0 (!%p212_p10), %v282_v8  ;;  %s810_s19 = scalar_lea.vmem (!%p212_p10), %s1077_s14, 16 }
  0x17   : > { %p811_p12 = scmp.ne.s32.totalorder (!%p212_p10), %s1077_s14, %s810_s19 }
  0x19   : > { %s244_s4 = scalar_select %p243_p11, %s880_s23, 1  ;;  %678 = vmatpush3.bf16.msra.mxu0 %v282_v8 }
  0x1a   : > { %p812_p13 = pnand %p811_p12, %p967_p4  ;;  %s893_s23 = smov [#allocation3]  }
  0x1b   : > { %s655_s26 = sshll.u32 %s244_s4, 7  ;;  %s814_s4 = sshll.u32 %s893_s23, 4  ;;  %s815_s4 = int_to_ptr.vmem [resolvable:$false] %s814_s4 }
  0x1c   : > { %s1005_s8 = scalar_lea.vmem %s1122_s0, %s655_s26  ;;  %p813_p0 = pneg %p812_p13 }
  0x1d   : > { %v253_v10 = vld [vmem:[%s1005_s8] sm:$0xff]  ;;  %v254_v11 = vld [vmem:[%s1005_s8 + $0x8] sm:$0xff]  ;;  %v255_v12 = vld [vmem:[%s1005_s8 + $0x10] sm:$0xff]  ;;  %s816_s26 = scalar_lea.vmem %s815_s4, 32  ;;  %p817_p1 = scmp.lt.s32.totalorder %s1077_s14, %s815_s4 }
  0x1e   : > { %v269_v13 = vpack.c.bf16 %v254_v11, %v253_v10  ;;  %v256_v14 = vld [vmem:[%s1005_s8 + $0x18] sm:$0xff]  ;;  %v257_v15 = vld [vmem:[%s1005_s8 + $0x20] sm:$0xff]  ;;  %v258_v16 = vld [vmem:[%s1005_s8 + $0x28] sm:$0xff]  ;;  %773 = vset.pattern.permute.xlu0 %v892_v36  ;;  %p818_p2 = scmp.lt.s32.totalorder %s816_s26, %s810_s19 }
  0x1f   : > { %v270_v17 = vpack.c.bf16 %v256_v14, %v255_v12  ;;  %v271_v18 = vpack.c.bf16 %v258_v16, %v257_v15  ;;  %v259_v19 = vld [vmem:[%s1005_s8 + $0x30] sm:$0xff]  ;;  %v260_v20 = vld [vmem:[%s1005_s8 + $0x38] sm:$0xff]  ;;  %v261_v21 = vld [vmem:[%s1005_s8 + $0x40] sm:$0xff]  ;;  %442 = vperm.xlu0 %773, %v439_v35  }
  0x20   : > { %679 = vmatprep.mubr.msk.bf16.mxu0 %vm290_vm0, %v269_v13  ;;  %v262_v22 = vld [vmem:[%s1005_s8 + $0x48] sm:$0xff]  ;;  %v272_v23 = vpack.c.bf16 %v260_v20, %v259_v19  ;;  %v263_v25 = vld [vmem:[%s1005_s8 + $0x50] sm:$0xff]  ;;  %v264_v26 = vld [vmem:[%s1005_s8 + $0x58] sm:$0xff]  ;;  %p819_p3 = por %p818_p2, %p817_p1 }
  0x21   : > { %680 = vmatmul.mubr.msk.bf16.vlgmr.msra.gmra.mrb[0].mxu0 %vm290_vm0, %v270_v17  ;;  %v273_v24 = vpack.c.bf16 %v262_v22, %v261_v21  ;;  %v265_v27 = vld [vmem:[%s1005_s8 + $0x60] sm:$0xff]  ;;  %v266_v28 = vld [vmem:[%s1005_s8 + $0x68] sm:$0xff]  ;;  %v274_v29 = vpack.c.bf16 %v264_v26, %v263_v25  ;;  %v267_v31 = vld [vmem:[%s1005_s8 + $0x70] sm:$0xff] }
  0x22   : > { %683 = vmatprep.mubr.msk.bf16.mxu0 %vm290_vm0, %v271_v18  ;;  %v275_v30 = vpack.c.bf16 %v266_v28, %v265_v27  ;;  %v268_v32 = vld [vmem:[%s1005_s8 + $0x78] sm:$0xff]  ;;  %p820_p5 = pnand %p819_p3, %p813_p0 }
  0x23   : > { %v276_v33 = vpack.c.bf16 %v268_v32, %v267_v31 }
  0x29   : > { %684 = vmatmul.mubr.msk.bf16.gmra.mrb[4].mxu0 %vm290_vm0, %v272_v23 }
  0x2a   : > { %687 = vmatprep.mubr.msk.bf16.mxu0 %vm290_vm0, %v273_v24 }
  0x31   : > { %688 = vmatmul.mubr.msk.bf16.gmra.mrb[8].mxu0 %vm290_vm0, %v274_v29 }
  0x32   : > { %691 = vmatprep.mubr.msk.bf16.mxu0 %vm290_vm0, %v275_v30 }
  0x39   : > { %692 = vmatmul.mubr.msk.bf16.gmra.mrb[12].mxu0 %vm290_vm0, %v276_v33 }
  0xf4   : > { %v681_v38 = vpop.f32.mrb[0].mxu0 }
  0xf5   : > { %v358_v39 = vadd.f32 %v681_v38, %v1036_v37  ;;  %v349_v40 = vpop.f32.mrb[1].mxu0 }
  0xf6   : > { %v350_v41 = vadd.f32 %v1036_v37, %v349_v40  ;;  %v682_v42 = vpop.f32.mrb[2].mxu0  ;;  %v445_v40 = vlaneseq }
  0xf7   : > { %774 = vtanh.f32 %v358_v39  ;;  %v361_v43 = vadd.f32 %v682_v42, %v1036_v37  ;;  %v352_v44 = vpop.f32.mrb[3].mxu0  ;;  %v457_v39 = vpop.trf.xlu0 }
  0xf8   : > { %776 = vtanh.f32 %v350_v41  ;;  %v353_v45 = vadd.f32 %v1036_v37, %v352_v44  ;;  %v446_v41 = vshrl.u32 %v445_v40, 7  ;;  %v534_v44 = vand.u32 127, %v445_v40 }
  0xf9   : > { %778 = vtanh.f32 %v361_v43 }
  0xfa   : > { %780 = vtanh.f32 %v353_v45  ;;  %v447_v42 = vsub.s32 0, %v446_v41  ;;  %vm538_vm3 = vcmp.lt.s32.totalorder %v534_v44, 16 }
  0xfb   : > { %v443_v43 = vpop.permute.xlu0 %442 }
  0xfc   : > { %v685_v46 = vpop.f32.mrb[4].mxu0  ;;  %v448_v45 = vrot.slane %v443_v43, %v447_v42 }
  0xfd   : > { %v374_v47 = vadd.f32 %v685_v46, %v1036_v37  ;;  %v365_v48 = vpop.f32.mrb[5].mxu0 }
  0xfe   : > { %v366_v49 = vadd.f32 %v1036_v37, %v365_v48  ;;  %v686_v50 = vpop.f32.mrb[6].mxu0 }
  0xff   : > { %782 = vtanh.f32 %v374_v47  ;;  %v377_v51 = vadd.f32 %v686_v50, %v1036_v37  ;;  %v368_v52 = vpop.f32.mrb[7].mxu0 }
 0x100   : > { %784 = vtanh.f32 %v366_v49  ;;  %v369_v53 = vadd.f32 %v1036_v37, %v368_v52 }
 0x101   : > { %v775_v54 = vpop.eup %774  ;;  %786 = vtanh.f32 %v377_v51 }
 0x102   : > { %v777_v55 = vpop.eup %776  ;;  %788 = vtanh.f32 %v369_v53 }
 0x103   : > { %v779_v56 = vpop.eup %778 }
 0x104   : > { %v781_v57 = vpop.eup %780  ;;  %v432_v58 = vpack.c.bf16 %v779_v56, %v775_v54  ;;  %v689_v59 = vpop.f32.mrb[8].mxu0 }
 0x105   : > { %v431_v60 = vpack.c.bf16 %v781_v57, %v777_v55  ;;  %v390_v61 = vadd.f32 %v689_v59, %v1036_v37  ;;  %v381_v62 = vpop.f32.mrb[9].mxu0 }
 0x106   : > { %v382_v63 = vadd.f32 %v1036_v37, %v381_v62  ;;  %v690_v0 = vpop.f32.mrb[10].mxu0  ;;  %v473_v16 = vsel %vm465_vm2, %v432_v58, 0 }
 0x107   : > { %v470_v1 = vsel %vm465_vm2, %v431_v60, 0  ;;  %790 = vtanh.f32 %v390_v61  ;;  %v393_v2 = vadd.f32 %v690_v0, %v1036_v37  ;;  %v384_v3 = vpop.f32.mrb[11].mxu0 }
 0x108   : > { %696 = vmatpush3.bf16.xpose.msra.mxu1 %v470_v1  ;;  %792 = vtanh.f32 %v382_v63  ;;  %v385_v4 = vadd.f32 %v1036_v37, %v384_v3 }
 0x109   : > { %v783_v5 = vpop.eup %782  ;;  %697 = vmatprep.subr.bf16.mxu1 %v890_v34  ;;  %794 = vtanh.f32 %v393_v2 }
 0x10a   : > { %v785_v6 = vpop.eup %784  ;;  %796 = vtanh.f32 %v385_v4 }
 0x10b   : > { %v787_v7 = vpop.eup %786 }
 0x10c   : > { %v789_v8 = vpop.eup %788  ;;  %v434_v9 = vpack.c.bf16 %v787_v7, %v783_v5  ;;  %v693_v10 = vpop.f32.mrb[12].mxu0 }
 0x10d   : > { %v433_v11 = vpack.c.bf16 %v789_v8, %v785_v6  ;;  %v406_v12 = vadd.f32 %v693_v10, %v1036_v37  ;;  %v397_v13 = vpop.f32.mrb[13].mxu0 }
 0x10e   : > { %v398_v14 = vadd.f32 %v1036_v37, %v397_v13  ;;  %v694_v15 = vpop.f32.mrb[14].mxu0  ;;  %v479_v33 = vsel %vm465_vm2, %v434_v9, 0 }
 0x10f   : > { %798 = vtanh.f32 %v406_v12  ;;  %v409_v17 = vadd.f32 %v694_v15, %v1036_v37  ;;  %v400_v18 = vpop.f32.mrb[15].mxu0  ;;  %v476_v26 = vsel %vm465_vm2, %v433_v11, 0 }
 0x110   : > { %698 = vmatpush3.bf16.xpose.msra.mxu1 %v473_v16  ;;  %800 = vtanh.f32 %v398_v14  ;;  %v401_v19 = vadd.f32 %v1036_v37, %v400_v18 }
 0x111   : > { %v791_v20 = vpop.eup %790  ;;  %699 = vmatprep.subr.bf16.mxu1 %v890_v34  ;;  %802 = vtanh.f32 %v409_v17 }
 0x112   : > { %v793_v21 = vpop.eup %792  ;;  %804 = vtanh.f32 %v401_v19 }
 0x113   : > { %v795_v22 = vpop.eup %794 }
 0x114   : > { %v797_v23 = vpop.eup %796  ;;  %v436_v24 = vpack.c.bf16 %v795_v22, %v791_v20 }
 0x115   : > { %v435_v25 = vpack.c.bf16 %v797_v23, %v793_v21 }
 0x116   : > { %v485_v36 = vsel %vm465_vm2, %v436_v24, 0 }
 0x117   : > { %v482_v35 = vsel %vm465_vm2, %v435_v25, 0 }
 0x118   : > { %700 = vmatpush3.bf16.xpose.msra.mxu1 %v476_v26 }
 0x119   : > { %v799_v27 = vpop.eup %798  ;;  %701 = vmatprep.subr.bf16.mxu1 %v890_v34 }
 0x11a   : > { %v801_v28 = vpop.eup %800 }
 0x11b   : > { %v803_v29 = vpop.eup %802 }
 0x11c   : > { %v805_v30 = vpop.eup %804  ;;  %v438_v31 = vpack.c.bf16 %v803_v29, %v799_v27 }
 0x11d   : > { %v437_v32 = vpack.c.bf16 %v805_v30, %v801_v28 }
 0x11e   : > { %v491_v38 = vsel %vm465_vm2, %v438_v31, 0 }
 0x11f   : > { %v488_v37 = vsel %vm465_vm2, %v437_v32, 0 }
 0x120   : > { %702 = vmatpush3.bf16.xpose.msra.mxu1 %v479_v33 }
 0x121   : > { %703 = vmatprep.subr.bf16.mxu1 %v890_v34 }
 0x128   : > { %704 = vmatpush3.bf16.xpose.msra.mxu1 %v482_v35 }
 0x129   : > { %705 = vmatprep.subr.bf16.mxu1 %v890_v34 }
 0x130   : > { %706 = vmatpush3.bf16.xpose.msra.mxu1 %v485_v36 }
 0x131   : > { %707 = vmatprep.subr.bf16.mxu1 %v890_v34 }
 0x138   : > { %708 = vmatpush3.bf16.xpose.msra.mxu1 %v488_v37 }
 0x139   : > { %709 = vmatprep.subr.bf16.mxu1 %v890_v34 }
 0x140   : > { %710 = vmatpush3.bf16.xpose.msra.mxu1 %v491_v38 }
 0x147   : > { %712 = vmatmul.mubr.msk.bf16.vlgmr.msra.gmra.mrb[0].mxu1 %vm465_vm2, %v457_v39 }
 0x21a   : > { %v527_v46 = vpop.f32.mrb[0].mxu1 }
 0x21b   : > { %v528_v47 = vadd.f32 %v527_v46, %v448_v45  ;;  %v713_v48 = vpop.f32.mrb[1].mxu1 }
 0x21c   : > { %v530_v34 = vpop.f32.mrb[2].mxu1 }
 0x21d   : > { %v714_v49 = vpop.f32.mrb[3].mxu1  ;;  %v539_v50 = vsel %vm538_vm3, %v528_v47, -1e+30 }
 0x21e   : > { %v541_v51 = vsel %vm540_vm4, %v539_v50, -inf }
 0x21f   : > { %542 = vmax.xlane.f32.xlu1 %v541_v51 }
 0x2ac   : > { %v543_v52 = vpop.xlane.xlu1 %542 }
 0x2ad   : > { %v544_v53 = vsub.f32 %v539_v50, %v543_v52 }
 0x2af   : > { %v545_v54 = vmul.f32 1.442695, %v544_v53 }
 0x2b1   : > { %806 = vpow2.f32 %v545_v54 }
 0x2bb   : > { %v807_v55 = vpop.eup %806 }
 0x2bc   : > { %v547_v56 = vsel %vm540_vm4, %v807_v55, 0.0 }
 0x2bd   : > { %548 = vadd.xlane.f32.xlu1 %v547_v56 }
 0x34a   : > { %v549_v57 = vpop.xlane.xlu1 %548 }
 0x34b   : > { %808 = vrcp.f32 %v549_v57 }
 0x355   : > { %v809_v58 = vpop.eup %808 }
 0x356   : > { %v551_v59 = vmul.f32 %v809_v58, %v807_v55 }
 0x358   : > { %552 = vst [vmem:[%s241_s13] sm:$0x1] %v551_v59 }
 0x359   : > { %823 = shalt.err (!%p820_p5)
}
 0x35a   : > { %s824_s28 = scalar_lea.hbm %s1075_s17, 16  ;;  %s828_s9 = scalar_lea.hbm %s1127_s5, 32 }
 0x35b   : > { %p825_p6 = scmp.ne.s32.totalorder %s1075_s17, %s824_s28  ;;  %p829_p10 = scmp.lt.u32.totalorder %s1075_s17, %s1127_s5 }
 0x35c   : > { %p830_p11 = scmp.lt.u32.totalorder %s828_s9, %s824_s28  ;;  %p832_p13 = scmp.lt.u32.totalorder %s824_s28, %s1075_s17 }
 0x35d   : > { %p826_p7 = pnand %p825_p6, %p967_p4 }
 0x35e   : > { %p831_p12 = por %p830_p11, %p829_p10 }
 0x35f   : > { %p827_p9 = pneg %p826_p7 }
 0x360   : > { %p833_p0 = por %p832_p13, %p831_p12 }
 0x362   : > { %p834_p1 = pnand %p833_p0, %p827_p9 }
 0x364   : > { %837 = shalt.err (!%p834_p1)
}
 0x365   : > { %715 = dma.vmem_to_hbm [thread:$0]  (%p967_p4), %s1077_s14, 16, %s1075_s17, %s554_s18  }
 0x366 PF: > { %p721_p2 = scmp.ge.s32.totalorder %s888_s25, 2  ;;  %s578_s12 = sand.u32 1, %s868_s20  }
 0x367   : > { %s579_s13 = scalar_lea.sflag [#allocation4], %s578_s12 }
 0x368   : > { %p718_p3 = pnand %p721_p2, %p974_p8 }
 0x36a   : > { %863 = dma.done.wait (!%p718_p3), %s579_s13, 16  }
 0x36b   : > { %865 = vsyncadd (!%p718_p3), %s579_s13, 4294967280  ;;  %s20_s25 = sadd.s32 1, %s888_s25   ;;  %s1130_s20 = smov %s872_s21 }
 0x36c   : > { %p17_p5 = scmp.ge.s32.totalorder %s20_s25, 4   ;;  %s1131_s21 = smov %s876_s22 }
 0x36d   : > { %s1132_s22 = smov %s980_s7  ;;  %s1133_s23 = smov %s884_s24 }
 0x36e   : > { %s1134_s24 = smov %s1136_s27  ;;  %19 = sbr.rel (!%p17_p5) target bundleno = 7 (0x7), region = 75 }
 0x375   :  { %583 = vsyncpa [#allocation4], 1 }
 0x376   :  { %585 = vsyncpa [#allocation4 + $0x1], 1 }

</bundles_post_ra>
